<compile_context>
chip_gen: v7x
topology: tpu7x:2x2x1
jax: 0.10.0
libtpu: 0.0.40
codegen_flags: <defaults>
</compile_context>

<pallas_src>
import functools

import jax
import jax.numpy as jnp
from jax import lax
from jax.experimental import pallas as pl
from jax.experimental.pallas import tpu as pltpu

BIG = 1.0e6  # sentinel used by the reference implementation for masked agents


def _cumsum_time(x):
    """Exact f32 prefix sum over the sublane (time) axis of a (T, N) slab.

    T-1 masked row adds on the VPU: no MXU, no cross-lane movement, same
    sequential accumulation order as a plain cumsum.
    """
    T = x.shape[0]
    if T == 1:
        return x
    t_iota = lax.broadcasted_iota(jnp.int32, x.shape, 0)
    cum = jnp.broadcast_to(x[0:1, :], x.shape)
    for s in range(1, T):
        cum = cum + jnp.where(t_iota >= s, x[s:s + 1, :], 0.0)
    return cum


def _plan_col_kernel(ego_ref, side_ref, fut_ref, out_ref, *,
                     num_batch, num_agent, agent_thresh,
                     x_dis_thresh, y_dis_thresh, dis_thresh):
    """Whole-batch kernel.  Lane axis = N = B*A for every large tensor.

       ego_ref  (2, T, N)      ego cum-positions (x row 0, y row 1), already
                               cumsum'd in the wrapper and broadcast over A
       side_ref (M+12, N)      rows [0:M]     fut-mode cls scores
                               rows [M:M+10]  per-class agent scores
                               row  [M+10]    agent x position
                               row  [M+11]    agent y position
       fut_ref  (2M, T, N)     rows [0:M] x deltas per mode, [M:2M] y deltas
       out_ref  (2, T, B)      row 0 = x collision loss, row 1 = y loss
    """
    twoM, T, N = fut_ref.shape
    M = twoM // 2
    B, A = num_batch, num_agent
    assert B * A == N
    assert side_ref.shape == (M + 12, N)
    assert ego_ref.shape == (2, T, N)
    assert out_ref.shape == (2, T, B)
    f32 = jnp.float32

    # ---- agent validity (replaces boolean fancy-index assignment) ----------
    score = side_ref[M:M + 10, :]                                    # (10, N)
    veh_max = jnp.max(score[0:5, :], axis=0, keepdims=True)          # classes 0..4
    nonveh_max = jnp.max(score[5:10, :], axis=0, keepdims=True)      # classes 5..9
    max_score = jnp.maximum(veh_max, nonveh_max)                     # (1, N)
    # argmax(score) > 4  <=>  max(classes 5..9) > max(classes 0..4); matches
    # the reference first-index argmax under the no-NaN / exact-tie convention.
    invalid = (max_score < agent_thresh) | (nonveh_max > veh_max)    # (1, N)

    # ---- best fut_mode via first-argmax (replaces gather) ------------------
    cls = side_ref[0:M, :]                                           # (M, N)
    cls_max = jnp.max(cls, axis=0, keepdims=True)                    # (1, N)
    mode_iota = lax.broadcasted_iota(jnp.int32, (M, N), 0)
    first_idx = jnp.min(jnp.where(cls == cls_max, mode_iota, M),
                        axis=0, keepdims=True)                       # (1, N)

    # ---- where-select the best mode (no mul-acc, no 0*inf) -----------------
    selx = fut_ref[0, :, :]                                          # (T, N)
    sely = fut_ref[M, :, :]
    for m in range(1, M):                                            # M static & small
        pick = first_idx == m                                        # (1, N)
        selx = jnp.where(pick, fut_ref[m, :, :], selx)
        sely = jnp.where(pick, fut_ref[M + m, :, :], sely)
    # BIG sentinel gets cumsum-ed below (up to T*BIG), exactly like the
    # reference; fine in f32 at these magnitudes.
    selx = jnp.where(invalid, BIG, selx)
    sely = jnp.where(invalid, BIG, sely)

    # ---- time cumsum: pure VPU, exact f32 -----------------------------------
    cumx = _cumsum_time(selx)                                        # (T, N)
    cumy = _cumsum_time(sely)

    agent_x = side_ref[M + 10:M + 11, :]                             # (1, N)
    agent_y = side_ref[M + 11:M + 12, :]
    tx = agent_x + cumx                                              # (T, N)
    ty = agent_y + cumy

    egox = ego_ref[0, :, :]                                          # (T, N)
    egoy = ego_ref[1, :, :]

    # ---- distance gate (squared, no sqrt) -----------------------------------
    dx = egox - tx
    dy = egoy - ty
    far = (dx * dx + dy * dy) > (dis_thresh * dis_thresh)
    tx = jnp.where(far, BIG, tx)
    ty = jnp.where(far, BIG, ty)
    adx = jnp.abs(egox - tx)                                         # (T, N)
    ady = jnp.abs(egoy - ty)

    # ---- per-batch min over agents (lane slice + lane reduce) ---------------
    b_iota = lax.broadcasted_iota(jnp.int32, (T, B), 1)
    x_loss = jnp.zeros((T, B), f32)
    y_loss = jnp.zeros((T, B), f32)
    for b in range(B):                                               # B static & tiny
        lo = b * A
        xm = jnp.min(adx[:, lo:lo + A], axis=-1, keepdims=True)      # (T, 1)
        ym = jnp.min(ady[:, lo:lo + A], axis=-1, keepdims=True)
        xl = jnp.where(xm > x_dis_thresh, 0.0, x_dis_thresh - xm)
        yl = jnp.where(ym > y_dis_thresh, 0.0, y_dis_thresh - ym)
        x_loss = jnp.where(b_iota == b, xl, x_loss)
        y_loss = jnp.where(b_iota == b, yl, y_loss)

    # two lane-dense slab stores (no single-lane masked writes)
    out_ref[0, :, :] = x_loss.astype(out_ref.dtype)
    out_ref[1, :, :] = y_loss.astype(out_ref.dtype)


class PlanCollisionLoss:
    """JAX/Pallas reimplementation of VAD's PlanCollisionLoss forward pass."""

    def __init__(self, reduction='mean', loss_weight=1.0, agent_thresh=0.5,
                 x_dis_thresh=1.5, y_dis_thresh=3.0, dis_thresh=3.0,
                 point_cloud_range=(-15.0, -30.0, -2.0, 15.0, 30.0, 2.0)):
        self.reduction = reduction
        self.loss_weight = loss_weight
        self.agent_thresh = agent_thresh
        self.x_dis_thresh = x_dis_thresh
        self.y_dis_thresh = y_dis_thresh
        self.dis_thresh = dis_thresh
        self.pc_range = point_cloud_range

    def __call__(self, ego_fut_preds, agent_preds, agent_fut_preds,
                 agent_score_preds, agent_fut_cls_preds, weight=None,
                 avg_factor=None, reduction_override=None):
        assert reduction_override in (None, 'none', 'mean', 'sum')
        reduction = reduction_override if reduction_override else self.reduction

        B, T, _ = ego_fut_preds.shape
        _, A, M, _, _ = agent_fut_preds.shape
        N = B * A
        dtype = jnp.float32

        # --- input prep (plain XLA; fuses into upstream ops) -----------------
        # ego cumsum hoisted out of the kernel; pre-broadcast over agents so the
        # kernel sees a lane-dense (2, T, B*A) slab.
        ego_cum = jnp.cumsum(ego_fut_preds.astype(dtype), axis=1)       # (B,T,2)
        ego = jnp.broadcast_to(
            jnp.transpose(ego_cum, (2, 1, 0))[:, :, :, None],
            (2, T, B, A)).reshape(2, T, N)

        # per-agent side data packed lane-major (B folded into lanes)
        side = jnp.concatenate([
            jnp.transpose(agent_fut_cls_preds.astype(dtype), (2, 0, 1)),  # (M,B,A)
            jnp.transpose(agent_score_preds.astype(dtype), (2, 0, 1)),    # (10,B,A)
            jnp.transpose(agent_preds.astype(dtype), (2, 0, 1)),          # (2,B,A)
        ], axis=0).reshape(M + 12, N)                                     # (M+12,N)

        # fut deltas: (B,A,M,T,2) -> (coord, mode, time, batch, agent) -> (2M,T,N)
        fut = jnp.transpose(agent_fut_preds.astype(dtype),
                            (4, 2, 3, 0, 1)).reshape(2 * M, T, N)

        kernel = functools.partial(
            _plan_col_kernel,
            num_batch=B, num_agent=A,
            agent_thresh=self.agent_thresh,
            x_dis_thresh=self.x_dis_thresh,
            y_dis_thresh=self.y_dis_thresh,
            dis_thresh=self.dis_thresh,
        )

        # explicit VMEM budget from padded operand sizes (+ headroom for slabs)
        def _rup(v, m):
            return -(-v // m) * m
        n_pad, t_pad = _rup(N, 128), _rup(T, 8)
        op_bytes = 4 * (2 * M * t_pad * n_pad            # fut
                        + _rup(M + 12, 8) * n_pad        # side
                        + 2 * t_pad * n_pad              # ego
                        + 2 * t_pad * _rup(B, 128))      # out
        vmem_limit = int(min(max(6 * op_bytes, 32 << 20), 64 << 20))

        vmem = pl.BlockSpec(memory_space=pltpu.MemorySpace.VMEM)
        out = pl.pallas_call(
            kernel,
            out_shape=jax.ShapeDtypeStruct((2, T, B), dtype),
            in_specs=[vmem, vmem, vmem],
            out_specs=vmem,
            compiler_params=pltpu.CompilerParams(vmem_limit_bytes=vmem_limit),
        )(ego, side, fut)                                              # (2,T,B)

        loss = jnp.transpose(out, (2, 1, 0))                           # (B,T,2)

        # mmdet weight_reduce_loss semantics
        if weight is not None:
            loss = loss * weight.astype(dtype)
        if avg_factor is None:
            if reduction == 'mean':
                red = jnp.mean(loss)
            elif reduction == 'sum':
                red = jnp.sum(loss)
            else:
                red = loss
        else:
            assert reduction == 'mean'
            red = jnp.sum(loss) / avg_factor
        return self.loss_weight * red


def _reference(ego, agent, fut, score, cls, weight, loss_weight=1.0,
               agent_thresh=0.5, x_th=1.5, y_th=3.0, dis_th=3.0):
    """Pure-JAX mirror of the PyTorch forward, for validation."""
    max_score = jnp.max(score, axis=-1)
    max_idx = jnp.argmax(score, axis=-1)
    invalid = (max_score < agent_thresh) | (max_idx > 4)
    fut = jnp.where(invalid[:, :, None, None, None], BIG, fut)
    best = jnp.argmax(cls, axis=-1)
    sel = jnp.take_along_axis(fut, best[:, :, None, None, None], axis=2)
    sel = jnp.squeeze(sel, axis=2)                                   # [B, A, T, 2]
    pred = jnp.cumsum(ego, axis=-2)
    selc = jnp.cumsum(sel, axis=-2)
    target = agent[:, :, None, :] + selc
    dist = jnp.linalg.norm(pred[:, None] - target, axis=-1)
    target = jnp.where((dist > dis_th)[..., None], BIG, target)
    x_dist = jnp.abs(pred[:, None, :, 0] - target[..., 0])
    y_dist = jnp.abs(pred[:, None, :, 1] - target[..., 1])
    x_min = jnp.min(x_dist, axis=1)
    y_min = jnp.min(y_dist, axis=1)
    x_loss = jnp.where(x_min > x_th, 0.0, x_th - x_min)
    y_loss = jnp.where(y_min > y_th, 0.0, y_th - y_min)
    loss = jnp.stack([x_loss, y_loss], axis=-1) * weight
    return loss_weight * jnp.mean(loss)


if __name__ == "__main__":
    B, A, M, T = 2, 8, 6, 8   # batch, num_agent, fut_mode, fut_ts
    key = jax.random.PRNGKey(0)
    k0, k1, k2, k3, k4 = jax.random.split(key, 5)

    ego_fut_preds = jax.random.normal(k0, (B, T, 2), jnp.float32) * 0.5
    agent_preds = jax.random.normal(k1, (B, A, 2), jnp.float32) * 2.0
    agent_fut_preds = jax.random.normal(k2, (B, A, M, T, 2), jnp.float32) * 0.5
    agent_score_preds = jax.random.uniform(k3, (B, A, 10), jnp.float32)
    agent_fut_cls_preds = jax.random.normal(k4, (B, A, M), jnp.float32)
    weight = jnp.ones((B, T, 2), jnp.float32)

    loss_mod = PlanCollisionLoss()
    out = loss_mod(ego_fut_preds, agent_preds, agent_fut_preds,
                   agent_score_preds, agent_fut_cls_preds, weight=weight)
    out = jax.block_until_ready(out)

    ref = _reference(ego_fut_preds, agent_preds, agent_fut_preds,
                     agent_score_preds, agent_fut_cls_preds, weight)
    ref = jax.block_until_ready(ref)

    assert jnp.allclose(out, ref, rtol=1e-4, atol=1e-4), (out, ref)
    print("KERNEL_OK")
</pallas_src>

<mosaic_0001>
module attributes {stable_mosaic.version = 11 : i64} {
  func.func @_plan_col_kernel(%arg0: memref<2x8x16xf32, #tpu.memory_space<vmem>>, %arg1: memref<18x16xf32, #tpu.memory_space<vmem>>, %arg2: memref<12x8x16xf32, #tpu.memory_space<vmem>>, %arg3: memref<2x8x2xf32, #tpu.memory_space<vmem>>) attributes {dimension_semantics = [], scalar_prefetch = 0 : i64, scratch_operands = 0 : i64, tpu.core_type = #tpu.core_type<tc>} {
    %c6 = arith.constant 6 : index
    %c0 = arith.constant 0 : index
    %0 = vector.load %arg1[%c6, %c0] : memref<18x16xf32, #tpu.memory_space<vmem>>, vector<10x16xf32>
    %1 = vector.extract_strided_slice %0 {offsets = [0, 0], sizes = [5, 16], strides = [1, 1]} : vector<10x16xf32> to vector<5x16xf32>
    %cst = arith.constant dense<0xFF800000> : vector<16xf32>
    %2 = vector.multi_reduction <maximumf>, %1, %cst [0] : vector<5x16xf32> to vector<16xf32>
    %3 = vector.shape_cast %2 : vector<16xf32> to vector<1x16xf32>
    %4 = vector.extract_strided_slice %0 {offsets = [5, 0], sizes = [5, 16], strides = [1, 1]} : vector<10x16xf32> to vector<5x16xf32>
    %cst_0 = arith.constant dense<0xFF800000> : vector<16xf32>
    %5 = vector.multi_reduction <maximumf>, %4, %cst_0 [0] : vector<5x16xf32> to vector<16xf32>
    %6 = vector.shape_cast %5 : vector<16xf32> to vector<1x16xf32>
    %7 = arith.maximumf %3, %6 : vector<1x16xf32>
    %cst_1 = arith.constant 5.000000e-01 : f32
    %8 = vector.broadcast %cst_1 : f32 to vector<1x16xf32>
    %9 = arith.cmpf olt, %7, %8 : vector<1x16xf32>
    %10 = arith.cmpf ogt, %6, %3 : vector<1x16xf32>
    %11 = arith.ori %9, %10 : vector<1x16xi1>
    %c0_2 = arith.constant 0 : index
    %c0_3 = arith.constant 0 : index
    %12 = vector.load %arg1[%c0_2, %c0_3] : memref<18x16xf32, #tpu.memory_space<vmem>>, vector<6x16xf32>
    %cst_4 = arith.constant dense<0xFF800000> : vector<16xf32>
    %13 = vector.multi_reduction <maximumf>, %12, %cst_4 [0] : vector<6x16xf32> to vector<16xf32>
    %14 = vector.shape_cast %13 : vector<16xf32> to vector<1x16xf32>
    %15 = tpu.iota {dimensions = array<i32: 0>} : vector<6x16xi32>
    %16 = vector.broadcast %14 : vector<1x16xf32> to vector<6x16xf32>
    %17 = arith.cmpf oeq, %12, %16 : vector<6x16xf32>
    %c6_i32 = arith.constant 6 : i32
    %18 = vector.broadcast %c6_i32 : i32 to vector<6x16xi32>
    %19 = arith.select %17, %15, %18 : vector<6x16xi1>, vector<6x16xi32>
    %cst_5 = arith.constant dense<2147483647> : vector<16xi32>
    %20 = vector.multi_reduction <minsi>, %19, %cst_5 [0] : vector<6x16xi32> to vector<16xi32>
    %21 = vector.shape_cast %20 : vector<16xi32> to vector<1x16xi32>
    %c0_6 = arith.constant 0 : index
    %c0_7 = arith.constant 0 : index
    %c0_8 = arith.constant 0 : index
    %22 = vector.load %arg2[%c0_6, %c0_7, %c0_8] : memref<12x8x16xf32, #tpu.memory_space<vmem>>, vector<1x8x16xf32>
    %23 = vector.shape_cast %22 : vector<1x8x16xf32> to vector<8x16xf32>
    %c6_9 = arith.constant 6 : index
    %c0_10 = arith.constant 0 : index
    %c0_11 = arith.constant 0 : index
    %24 = vector.load %arg2[%c6_9, %c0_10, %c0_11] : memref<12x8x16xf32, #tpu.memory_space<vmem>>, vector<1x8x16xf32>
    %25 = vector.shape_cast %24 : vector<1x8x16xf32> to vector<8x16xf32>
    %c1_i32 = arith.constant 1 : i32
    %26 = vector.broadcast %c1_i32 : i32 to vector<1x16xi32>
    %27 = arith.cmpi eq, %21, %26 : vector<1x16xi32>
    %c1 = arith.constant 1 : index
    %c0_12 = arith.constant 0 : index
    %c0_13 = arith.constant 0 : index
    %28 = vector.load %arg2[%c1, %c0_12, %c0_13] : memref<12x8x16xf32, #tpu.memory_space<vmem>>, vector<1x8x16xf32>
    %29 = vector.shape_cast %28 : vector<1x8x16xf32> to vector<8x16xf32>
    %30 = vector.shape_cast %27 : vector<1x16xi1> to vector<1x16xi1>
    %31 = vector.broadcast %30 : vector<1x16xi1> to vector<8x16xi1>
    %32 = arith.select %31, %29, %23 : vector<8x16xi1>, vector<8x16xf32>
    %c7 = arith.constant 7 : index
    %c0_14 = arith.constant 0 : index
    %c0_15 = arith.constant 0 : index
    %33 = vector.load %arg2[%c7, %c0_14, %c0_15] : memref<12x8x16xf32, #tpu.memory_space<vmem>>, vector<1x8x16xf32>
    %34 = vector.shape_cast %33 : vector<1x8x16xf32> to vector<8x16xf32>
    %35 = vector.shape_cast %27 : vector<1x16xi1> to vector<1x16xi1>
    %36 = vector.broadcast %35 : vector<1x16xi1> to vector<8x16xi1>
    %37 = arith.select %36, %34, %25 : vector<8x16xi1>, vector<8x16xf32>
    %c2_i32 = arith.constant 2 : i32
    %38 = vector.broadcast %c2_i32 : i32 to vector<1x16xi32>
    %39 = arith.cmpi eq, %21, %38 : vector<1x16xi32>
    %c2 = arith.constant 2 : index
    %c0_16 = arith.constant 0 : index
    %c0_17 = arith.constant 0 : index
    %40 = vector.load %arg2[%c2, %c0_16, %c0_17] : memref<12x8x16xf32, #tpu.memory_space<vmem>>, vector<1x8x16xf32>
    %41 = vector.shape_cast %40 : vector<1x8x16xf32> to vector<8x16xf32>
    %42 = vector.shape_cast %39 : vector<1x16xi1> to vector<1x16xi1>
    %43 = vector.broadcast %42 : vector<1x16xi1> to vector<8x16xi1>
    %44 = arith.select %43, %41, %32 : vector<8x16xi1>, vector<8x16xf32>
    %c8 = arith.constant 8 : index
    %c0_18 = arith.constant 0 : index
    %c0_19 = arith.constant 0 : index
    %45 = vector.load %arg2[%c8, %c0_18, %c0_19] : memref<12x8x16xf32, #tpu.memory_space<vmem>>, vector<1x8x16xf32>
    %46 = vector.shape_cast %45 : vector<1x8x16xf32> to vector<8x16xf32>
    %47 = vector.shape_cast %39 : vector<1x16xi1> to vector<1x16xi1>
    %48 = vector.broadcast %47 : vector<1x16xi1> to vector<8x16xi1>
    %49 = arith.select %48, %46, %37 : vector<8x16xi1>, vector<8x16xf32>
    %c3_i32 = arith.constant 3 : i32
    %50 = vector.broadcast %c3_i32 : i32 to vector<1x16xi32>
    %51 = arith.cmpi eq, %21, %50 : vector<1x16xi32>
    %c3 = arith.constant 3 : index
    %c0_20 = arith.constant 0 : index
    %c0_21 = arith.constant 0 : index
    %52 = vector.load %arg2[%c3, %c0_20, %c0_21] : memref<12x8x16xf32, #tpu.memory_space<vmem>>, vector<1x8x16xf32>
    %53 = vector.shape_cast %52 : vector<1x8x16xf32> to vector<8x16xf32>
    %54 = vector.shape_cast %51 : vector<1x16xi1> to vector<1x16xi1>
    %55 = vector.broadcast %54 : vector<1x16xi1> to vector<8x16xi1>
    %56 = arith.select %55, %53, %44 : vector<8x16xi1>, vector<8x16xf32>
    %c9 = arith.constant 9 : index
    %c0_22 = arith.constant 0 : index
    %c0_23 = arith.constant 0 : index
    %57 = vector.load %arg2[%c9, %c0_22, %c0_23] : memref<12x8x16xf32, #tpu.memory_space<vmem>>, vector<1x8x16xf32>
    %58 = vector.shape_cast %57 : vector<1x8x16xf32> to vector<8x16xf32>
    %59 = vector.shape_cast %51 : vector<1x16xi1> to vector<1x16xi1>
    %60 = vector.broadcast %59 : vector<1x16xi1> to vector<8x16xi1>
    %61 = arith.select %60, %58, %49 : vector<8x16xi1>, vector<8x16xf32>
    %c4_i32 = arith.constant 4 : i32
    %62 = vector.broadcast %c4_i32 : i32 to vector<1x16xi32>
    %63 = arith.cmpi eq, %21, %62 : vector<1x16xi32>
    %c4 = arith.constant 4 : index
    %c0_24 = arith.constant 0 : index
    %c0_25 = arith.constant 0 : index
    %64 = vector.load %arg2[%c4, %c0_24, %c0_25] : memref<12x8x16xf32, #tpu.memory_space<vmem>>, vector<1x8x16xf32>
    %65 = vector.shape_cast %64 : vector<1x8x16xf32> to vector<8x16xf32>
    %66 = vector.shape_cast %63 : vector<1x16xi1> to vector<1x16xi1>
    %67 = vector.broadcast %66 : vector<1x16xi1> to vector<8x16xi1>
    %68 = arith.select %67, %65, %56 : vector<8x16xi1>, vector<8x16xf32>
    %c10 = arith.constant 10 : index
    %c0_26 = arith.constant 0 : index
    %c0_27 = arith.constant 0 : index
    %69 = vector.load %arg2[%c10, %c0_26, %c0_27] : memref<12x8x16xf32, #tpu.memory_space<vmem>>, vector<1x8x16xf32>
    %70 = vector.shape_cast %69 : vector<1x8x16xf32> to vector<8x16xf32>
    %71 = vector.shape_cast %63 : vector<1x16xi1> to vector<1x16xi1>
    %72 = vector.broadcast %71 : vector<1x16xi1> to vector<8x16xi1>
    %73 = arith.select %72, %70, %61 : vector<8x16xi1>, vector<8x16xf32>
    %c5_i32 = arith.constant 5 : i32
    %74 = vector.broadcast %c5_i32 : i32 to vector<1x16xi32>
    %75 = arith.cmpi eq, %21, %74 : vector<1x16xi32>
    %c5 = arith.constant 5 : index
    %c0_28 = arith.constant 0 : index
    %c0_29 = arith.constant 0 : index
    %76 = vector.load %arg2[%c5, %c0_28, %c0_29] : memref<12x8x16xf32, #tpu.memory_space<vmem>>, vector<1x8x16xf32>
    %77 = vector.shape_cast %76 : vector<1x8x16xf32> to vector<8x16xf32>
    %78 = vector.shape_cast %75 : vector<1x16xi1> to vector<1x16xi1>
    %79 = vector.broadcast %78 : vector<1x16xi1> to vector<8x16xi1>
    %80 = arith.select %79, %77, %68 : vector<8x16xi1>, vector<8x16xf32>
    %c11 = arith.constant 11 : index
    %c0_30 = arith.constant 0 : index
    %c0_31 = arith.constant 0 : index
    %81 = vector.load %arg2[%c11, %c0_30, %c0_31] : memref<12x8x16xf32, #tpu.memory_space<vmem>>, vector<1x8x16xf32>
    %82 = vector.shape_cast %81 : vector<1x8x16xf32> to vector<8x16xf32>
    %83 = vector.shape_cast %75 : vector<1x16xi1> to vector<1x16xi1>
    %84 = vector.broadcast %83 : vector<1x16xi1> to vector<8x16xi1>
    %85 = arith.select %84, %82, %73 : vector<8x16xi1>, vector<8x16xf32>
    %cst_32 = arith.constant 1.000000e+06 : f32
    %86 = vector.shape_cast %11 : vector<1x16xi1> to vector<1x16xi1>
    %87 = vector.broadcast %86 : vector<1x16xi1> to vector<8x16xi1>
    %88 = vector.broadcast %cst_32 : f32 to vector<8x16xf32>
    %89 = arith.select %87, %88, %80 : vector<8x16xi1>, vector<8x16xf32>
    %cst_33 = arith.constant 1.000000e+06 : f32
    %90 = vector.shape_cast %11 : vector<1x16xi1> to vector<1x16xi1>
    %91 = vector.broadcast %90 : vector<1x16xi1> to vector<8x16xi1>
    %92 = vector.broadcast %cst_33 : f32 to vector<8x16xf32>
    %93 = arith.select %91, %92, %85 : vector<8x16xi1>, vector<8x16xf32>
    %94 = tpu.iota {dimensions = array<i32: 0>} : vector<8x16xi32>
    %95 = vector.extract_strided_slice %89 {offsets = [0, 0], sizes = [1, 16], strides = [1, 1]} : vector<8x16xf32> to vector<1x16xf32>
    %96 = vector.shape_cast %95 : vector<1x16xf32> to vector<1x16xf32>
    %97 = vector.broadcast %96 : vector<1x16xf32> to vector<8x16xf32>
    %c1_i32_34 = arith.constant 1 : i32
    %98 = vector.broadcast %c1_i32_34 : i32 to vector<8x16xi32>
    %99 = arith.cmpi sge, %94, %98 : vector<8x16xi32>
    %100 = vector.extract_strided_slice %89 {offsets = [1, 0], sizes = [1, 16], strides = [1, 1]} : vector<8x16xf32> to vector<1x16xf32>
    %cst_35 = arith.constant 0.000000e+00 : f32
    %101 = vector.shape_cast %100 : vector<1x16xf32> to vector<1x16xf32>
    %102 = vector.broadcast %101 : vector<1x16xf32> to vector<8x16xf32>
    %103 = vector.broadcast %cst_35 : f32 to vector<8x16xf32>
    %104 = arith.select %99, %102, %103 : vector<8x16xi1>, vector<8x16xf32>
    %105 = arith.addf %97, %104 : vector<8x16xf32>
    %c2_i32_36 = arith.constant 2 : i32
    %106 = vector.broadcast %c2_i32_36 : i32 to vector<8x16xi32>
    %107 = arith.cmpi sge, %94, %106 : vector<8x16xi32>
    %108 = vector.extract_strided_slice %89 {offsets = [2, 0], sizes = [1, 16], strides = [1, 1]} : vector<8x16xf32> to vector<1x16xf32>
    %cst_37 = arith.constant 0.000000e+00 : f32
    %109 = vector.shape_cast %108 : vector<1x16xf32> to vector<1x16xf32>
    %110 = vector.broadcast %109 : vector<1x16xf32> to vector<8x16xf32>
    %111 = vector.broadcast %cst_37 : f32 to vector<8x16xf32>
    %112 = arith.select %107, %110, %111 : vector<8x16xi1>, vector<8x16xf32>
    %113 = arith.addf %105, %112 : vector<8x16xf32>
    %c3_i32_38 = arith.constant 3 : i32
    %114 = vector.broadcast %c3_i32_38 : i32 to vector<8x16xi32>
    %115 = arith.cmpi sge, %94, %114 : vector<8x16xi32>
    %116 = vector.extract_strided_slice %89 {offsets = [3, 0], sizes = [1, 16], strides = [1, 1]} : vector<8x16xf32> to vector<1x16xf32>
    %cst_39 = arith.constant 0.000000e+00 : f32
    %117 = vector.shape_cast %116 : vector<1x16xf32> to vector<1x16xf32>
    %118 = vector.broadcast %117 : vector<1x16xf32> to vector<8x16xf32>
    %119 = vector.broadcast %cst_39 : f32 to vector<8x16xf32>
    %120 = arith.select %115, %118, %119 : vector<8x16xi1>, vector<8x16xf32>
    %121 = arith.addf %113, %120 : vector<8x16xf32>
    %c4_i32_40 = arith.constant 4 : i32
    %122 = vector.broadcast %c4_i32_40 : i32 to vector<8x16xi32>
    %123 = arith.cmpi sge, %94, %122 : vector<8x16xi32>
    %124 = vector.extract_strided_slice %89 {offsets = [4, 0], sizes = [1, 16], strides = [1, 1]} : vector<8x16xf32> to vector<1x16xf32>
    %cst_41 = arith.constant 0.000000e+00 : f32
    %125 = vector.shape_cast %124 : vector<1x16xf32> to vector<1x16xf32>
    %126 = vector.broadcast %125 : vector<1x16xf32> to vector<8x16xf32>
    %127 = vector.broadcast %cst_41 : f32 to vector<8x16xf32>
    %128 = arith.select %123, %126, %127 : vector<8x16xi1>, vector<8x16xf32>
    %129 = arith.addf %121, %128 : vector<8x16xf32>
    %c5_i32_42 = arith.constant 5 : i32
    %130 = vector.broadcast %c5_i32_42 : i32 to vector<8x16xi32>
    %131 = arith.cmpi sge, %94, %130 : vector<8x16xi32>
    %132 = vector.extract_strided_slice %89 {offsets = [5, 0], sizes = [1, 16], strides = [1, 1]} : vector<8x16xf32> to vector<1x16xf32>
    %cst_43 = arith.constant 0.000000e+00 : f32
    %133 = vector.shape_cast %132 : vector<1x16xf32> to vector<1x16xf32>
    %134 = vector.broadcast %133 : vector<1x16xf32> to vector<8x16xf32>
    %135 = vector.broadcast %cst_43 : f32 to vector<8x16xf32>
    %136 = arith.select %131, %134, %135 : vector<8x16xi1>, vector<8x16xf32>
    %137 = arith.addf %129, %136 : vector<8x16xf32>
    %c6_i32_44 = arith.constant 6 : i32
    %138 = vector.broadcast %c6_i32_44 : i32 to vector<8x16xi32>
    %139 = arith.cmpi sge, %94, %138 : vector<8x16xi32>
    %140 = vector.extract_strided_slice %89 {offsets = [6, 0], sizes = [1, 16], strides = [1, 1]} : vector<8x16xf32> to vector<1x16xf32>
    %cst_45 = arith.constant 0.000000e+00 : f32
    %141 = vector.shape_cast %140 : vector<1x16xf32> to vector<1x16xf32>
    %142 = vector.broadcast %141 : vector<1x16xf32> to vector<8x16xf32>
    %143 = vector.broadcast %cst_45 : f32 to vector<8x16xf32>
    %144 = arith.select %139, %142, %143 : vector<8x16xi1>, vector<8x16xf32>
    %145 = arith.addf %137, %144 : vector<8x16xf32>
    %c7_i32 = arith.constant 7 : i32
    %146 = vector.broadcast %c7_i32 : i32 to vector<8x16xi32>
    %147 = arith.cmpi sge, %94, %146 : vector<8x16xi32>
    %148 = vector.extract_strided_slice %89 {offsets = [7, 0], sizes = [1, 16], strides = [1, 1]} : vector<8x16xf32> to vector<1x16xf32>
    %cst_46 = arith.constant 0.000000e+00 : f32
    %149 = vector.shape_cast %148 : vector<1x16xf32> to vector<1x16xf32>
    %150 = vector.broadcast %149 : vector<1x16xf32> to vector<8x16xf32>
    %151 = vector.broadcast %cst_46 : f32 to vector<8x16xf32>
    %152 = arith.select %147, %150, %151 : vector<8x16xi1>, vector<8x16xf32>
    %153 = arith.addf %145, %152 : vector<8x16xf32>
    %154 = tpu.iota {dimensions = array<i32: 0>} : vector<8x16xi32>
    %155 = vector.extract_strided_slice %93 {offsets = [0, 0], sizes = [1, 16], strides = [1, 1]} : vector<8x16xf32> to vector<1x16xf32>
    %156 = vector.shape_cast %155 : vector<1x16xf32> to vector<1x16xf32>
    %157 = vector.broadcast %156 : vector<1x16xf32> to vector<8x16xf32>
    %c1_i32_47 = arith.constant 1 : i32
    %158 = vector.broadcast %c1_i32_47 : i32 to vector<8x16xi32>
    %159 = arith.cmpi sge, %154, %158 : vector<8x16xi32>
    %160 = vector.extract_strided_slice %93 {offsets = [1, 0], sizes = [1, 16], strides = [1, 1]} : vector<8x16xf32> to vector<1x16xf32>
    %cst_48 = arith.constant 0.000000e+00 : f32
    %161 = vector.shape_cast %160 : vector<1x16xf32> to vector<1x16xf32>
    %162 = vector.broadcast %161 : vector<1x16xf32> to vector<8x16xf32>
    %163 = vector.broadcast %cst_48 : f32 to vector<8x16xf32>
    %164 = arith.select %159, %162, %163 : vector<8x16xi1>, vector<8x16xf32>
    %165 = arith.addf %157, %164 : vector<8x16xf32>
    %c2_i32_49 = arith.constant 2 : i32
    %166 = vector.broadcast %c2_i32_49 : i32 to vector<8x16xi32>
    %167 = arith.cmpi sge, %154, %166 : vector<8x16xi32>
    %168 = vector.extract_strided_slice %93 {offsets = [2, 0], sizes = [1, 16], strides = [1, 1]} : vector<8x16xf32> to vector<1x16xf32>
    %cst_50 = arith.constant 0.000000e+00 : f32
    %169 = vector.shape_cast %168 : vector<1x16xf32> to vector<1x16xf32>
    %170 = vector.broadcast %169 : vector<1x16xf32> to vector<8x16xf32>
    %171 = vector.broadcast %cst_50 : f32 to vector<8x16xf32>
    %172 = arith.select %167, %170, %171 : vector<8x16xi1>, vector<8x16xf32>
    %173 = arith.addf %165, %172 : vector<8x16xf32>
    %c3_i32_51 = arith.constant 3 : i32
    %174 = vector.broadcast %c3_i32_51 : i32 to vector<8x16xi32>
    %175 = arith.cmpi sge, %154, %174 : vector<8x16xi32>
    %176 = vector.extract_strided_slice %93 {offsets = [3, 0], sizes = [1, 16], strides = [1, 1]} : vector<8x16xf32> to vector<1x16xf32>
    %cst_52 = arith.constant 0.000000e+00 : f32
    %177 = vector.shape_cast %176 : vector<1x16xf32> to vector<1x16xf32>
    %178 = vector.broadcast %177 : vector<1x16xf32> to vector<8x16xf32>
    %179 = vector.broadcast %cst_52 : f32 to vector<8x16xf32>
    %180 = arith.select %175, %178, %179 : vector<8x16xi1>, vector<8x16xf32>
    %181 = arith.addf %173, %180 : vector<8x16xf32>
    %c4_i32_53 = arith.constant 4 : i32
    %182 = vector.broadcast %c4_i32_53 : i32 to vector<8x16xi32>
    %183 = arith.cmpi sge, %154, %182 : vector<8x16xi32>
    %184 = vector.extract_strided_slice %93 {offsets = [4, 0], sizes = [1, 16], strides = [1, 1]} : vector<8x16xf32> to vector<1x16xf32>
    %cst_54 = arith.constant 0.000000e+00 : f32
    %185 = vector.shape_cast %184 : vector<1x16xf32> to vector<1x16xf32>
    %186 = vector.broadcast %185 : vector<1x16xf32> to vector<8x16xf32>
    %187 = vector.broadcast %cst_54 : f32 to vector<8x16xf32>
    %188 = arith.select %183, %186, %187 : vector<8x16xi1>, vector<8x16xf32>
    %189 = arith.addf %181, %188 : vector<8x16xf32>
    %c5_i32_55 = arith.constant 5 : i32
    %190 = vector.broadcast %c5_i32_55 : i32 to vector<8x16xi32>
    %191 = arith.cmpi sge, %154, %190 : vector<8x16xi32>
    %192 = vector.extract_strided_slice %93 {offsets = [5, 0], sizes = [1, 16], strides = [1, 1]} : vector<8x16xf32> to vector<1x16xf32>
    %cst_56 = arith.constant 0.000000e+00 : f32
    %193 = vector.shape_cast %192 : vector<1x16xf32> to vector<1x16xf32>
    %194 = vector.broadcast %193 : vector<1x16xf32> to vector<8x16xf32>
    %195 = vector.broadcast %cst_56 : f32 to vector<8x16xf32>
    %196 = arith.select %191, %194, %195 : vector<8x16xi1>, vector<8x16xf32>
    %197 = arith.addf %189, %196 : vector<8x16xf32>
    %c6_i32_57 = arith.constant 6 : i32
    %198 = vector.broadcast %c6_i32_57 : i32 to vector<8x16xi32>
    %199 = arith.cmpi sge, %154, %198 : vector<8x16xi32>
    %200 = vector.extract_strided_slice %93 {offsets = [6, 0], sizes = [1, 16], strides = [1, 1]} : vector<8x16xf32> to vector<1x16xf32>
    %cst_58 = arith.constant 0.000000e+00 : f32
    %201 = vector.shape_cast %200 : vector<1x16xf32> to vector<1x16xf32>
    %202 = vector.broadcast %201 : vector<1x16xf32> to vector<8x16xf32>
    %203 = vector.broadcast %cst_58 : f32 to vector<8x16xf32>
    %204 = arith.select %199, %202, %203 : vector<8x16xi1>, vector<8x16xf32>
    %205 = arith.addf %197, %204 : vector<8x16xf32>
    %c7_i32_59 = arith.constant 7 : i32
    %206 = vector.broadcast %c7_i32_59 : i32 to vector<8x16xi32>
    %207 = arith.cmpi sge, %154, %206 : vector<8x16xi32>
    %208 = vector.extract_strided_slice %93 {offsets = [7, 0], sizes = [1, 16], strides = [1, 1]} : vector<8x16xf32> to vector<1x16xf32>
    %cst_60 = arith.constant 0.000000e+00 : f32
    %209 = vector.shape_cast %208 : vector<1x16xf32> to vector<1x16xf32>
    %210 = vector.broadcast %209 : vector<1x16xf32> to vector<8x16xf32>
    %211 = vector.broadcast %cst_60 : f32 to vector<8x16xf32>
    %212 = arith.select %207, %210, %211 : vector<8x16xi1>, vector<8x16xf32>
    %213 = arith.addf %205, %212 : vector<8x16xf32>
    %c16 = arith.constant 16 : index
    %c0_61 = arith.constant 0 : index
    %214 = vector.load %arg1[%c16, %c0_61] : memref<18x16xf32, #tpu.memory_space<vmem>>, vector<1x16xf32>
    %c17 = arith.constant 17 : index
    %c0_62 = arith.constant 0 : index
    %215 = vector.load %arg1[%c17, %c0_62] : memref<18x16xf32, #tpu.memory_space<vmem>>, vector<1x16xf32>
    %216 = vector.broadcast %214 : vector<1x16xf32> to vector<8x16xf32>
    %217 = arith.addf %216, %153 : vector<8x16xf32>
    %218 = vector.broadcast %215 : vector<1x16xf32> to vector<8x16xf32>
    %219 = arith.addf %218, %213 : vector<8x16xf32>
    %c0_63 = arith.constant 0 : index
    %c0_64 = arith.constant 0 : index
    %c0_65 = arith.constant 0 : index
    %220 = vector.load %arg0[%c0_63, %c0_64, %c0_65] : memref<2x8x16xf32, #tpu.memory_space<vmem>>, vector<1x8x16xf32>
    %221 = vector.shape_cast %220 : vector<1x8x16xf32> to vector<8x16xf32>
    %c1_66 = arith.constant 1 : index
    %c0_67 = arith.constant 0 : index
    %c0_68 = arith.constant 0 : index
    %222 = vector.load %arg0[%c1_66, %c0_67, %c0_68] : memref<2x8x16xf32, #tpu.memory_space<vmem>>, vector<1x8x16xf32>
    %223 = vector.shape_cast %222 : vector<1x8x16xf32> to vector<8x16xf32>
    %224 = arith.subf %221, %217 : vector<8x16xf32>
    %225 = arith.subf %223, %219 : vector<8x16xf32>
    %226 = arith.mulf %224, %224 : vector<8x16xf32>
    %227 = arith.mulf %225, %225 : vector<8x16xf32>
    %228 = arith.addf %226, %227 : vector<8x16xf32>
    %cst_69 = arith.constant 9.000000e+00 : f32
    %229 = vector.broadcast %cst_69 : f32 to vector<8x16xf32>
    %230 = arith.cmpf ogt, %228, %229 : vector<8x16xf32>
    %cst_70 = arith.constant 1.000000e+06 : f32
    %231 = vector.broadcast %cst_70 : f32 to vector<8x16xf32>
    %232 = arith.select %230, %231, %217 : vector<8x16xi1>, vector<8x16xf32>
    %cst_71 = arith.constant 1.000000e+06 : f32
    %233 = vector.broadcast %cst_71 : f32 to vector<8x16xf32>
    %234 = arith.select %230, %233, %219 : vector<8x16xi1>, vector<8x16xf32>
    %235 = arith.subf %221, %232 : vector<8x16xf32>
    %236 = math.absf %235 : vector<8x16xf32>
    %237 = arith.subf %223, %234 : vector<8x16xf32>
    %238 = math.absf %237 : vector<8x16xf32>
    %239 = tpu.iota {dimensions = array<i32: 1>} : vector<8x2xi32>
    %cst_72 = arith.constant 0.000000e+00 : f32
    %240 = vector.broadcast %cst_72 : f32 to vector<8x2xf32>
    %cst_73 = arith.constant 0.000000e+00 : f32
    %241 = vector.broadcast %cst_73 : f32 to vector<8x2xf32>
    %242 = vector.extract_strided_slice %236 {offsets = [0, 0], sizes = [8, 8], strides = [1, 1]} : vector<8x16xf32> to vector<8x8xf32>
    %cst_74 = arith.constant dense<0x7F800000> : vector<8xf32>
    %243 = vector.multi_reduction <minimumf>, %242, %cst_74 [1] : vector<8x8xf32> to vector<8xf32>
    %244 = vector.shape_cast %243 : vector<8xf32> to vector<8x1xf32>
    %245 = vector.extract_strided_slice %238 {offsets = [0, 0], sizes = [8, 8], strides = [1, 1]} : vector<8x16xf32> to vector<8x8xf32>
    %cst_75 = arith.constant dense<0x7F800000> : vector<8xf32>
    %246 = vector.multi_reduction <minimumf>, %245, %cst_75 [1] : vector<8x8xf32> to vector<8xf32>
    %247 = vector.shape_cast %246 : vector<8xf32> to vector<8x1xf32>
    %cst_76 = arith.constant 1.500000e+00 : f32
    %248 = vector.broadcast %cst_76 : f32 to vector<8x1xf32>
    %249 = arith.cmpf ogt, %244, %248 : vector<8x1xf32>
    %cst_77 = arith.constant 1.500000e+00 : f32
    %250 = vector.broadcast %cst_77 : f32 to vector<8x1xf32>
    %251 = arith.subf %250, %244 : vector<8x1xf32>
    %cst_78 = arith.constant 0.000000e+00 : f32
    %252 = vector.broadcast %cst_78 : f32 to vector<8x1xf32>
    %253 = arith.select %249, %252, %251 : vector<8x1xi1>, vector<8x1xf32>
    %cst_79 = arith.constant 3.000000e+00 : f32
    %254 = vector.broadcast %cst_79 : f32 to vector<8x1xf32>
    %255 = arith.cmpf ogt, %247, %254 : vector<8x1xf32>
    %cst_80 = arith.constant 3.000000e+00 : f32
    %256 = vector.broadcast %cst_80 : f32 to vector<8x1xf32>
    %257 = arith.subf %256, %247 : vector<8x1xf32>
    %cst_81 = arith.constant 0.000000e+00 : f32
    %258 = vector.broadcast %cst_81 : f32 to vector<8x1xf32>
    %259 = arith.select %255, %258, %257 : vector<8x1xi1>, vector<8x1xf32>
    %c0_i32 = arith.constant 0 : i32
    %260 = vector.broadcast %c0_i32 : i32 to vector<8x2xi32>
    %261 = arith.cmpi eq, %239, %260 : vector<8x2xi32>
    %262 = vector.shape_cast %253 : vector<8x1xf32> to vector<8x1xf32>
    %263 = vector.broadcast %262 : vector<8x1xf32> to vector<8x2xf32>
    %264 = arith.select %261, %263, %240 : vector<8x2xi1>, vector<8x2xf32>
    %c0_i32_82 = arith.constant 0 : i32
    %265 = vector.broadcast %c0_i32_82 : i32 to vector<8x2xi32>
    %266 = arith.cmpi eq, %239, %265 : vector<8x2xi32>
    %267 = vector.shape_cast %259 : vector<8x1xf32> to vector<8x1xf32>
    %268 = vector.broadcast %267 : vector<8x1xf32> to vector<8x2xf32>
    %269 = arith.select %266, %268, %241 : vector<8x2xi1>, vector<8x2xf32>
    %270 = vector.extract_strided_slice %236 {offsets = [0, 8], sizes = [8, 8], strides = [1, 1]} : vector<8x16xf32> to vector<8x8xf32>
    %cst_83 = arith.constant dense<0x7F800000> : vector<8xf32>
    %271 = vector.multi_reduction <minimumf>, %270, %cst_83 [1] : vector<8x8xf32> to vector<8xf32>
    %272 = vector.shape_cast %271 : vector<8xf32> to vector<8x1xf32>
    %273 = vector.extract_strided_slice %238 {offsets = [0, 8], sizes = [8, 8], strides = [1, 1]} : vector<8x16xf32> to vector<8x8xf32>
    %cst_84 = arith.constant dense<0x7F800000> : vector<8xf32>
    %274 = vector.multi_reduction <minimumf>, %273, %cst_84 [1] : vector<8x8xf32> to vector<8xf32>
    %275 = vector.shape_cast %274 : vector<8xf32> to vector<8x1xf32>
    %cst_85 = arith.constant 1.500000e+00 : f32
    %276 = vector.broadcast %cst_85 : f32 to vector<8x1xf32>
    %277 = arith.cmpf ogt, %272, %276 : vector<8x1xf32>
    %cst_86 = arith.constant 1.500000e+00 : f32
    %278 = vector.broadcast %cst_86 : f32 to vector<8x1xf32>
    %279 = arith.subf %278, %272 : vector<8x1xf32>
    %cst_87 = arith.constant 0.000000e+00 : f32
    %280 = vector.broadcast %cst_87 : f32 to vector<8x1xf32>
    %281 = arith.select %277, %280, %279 : vector<8x1xi1>, vector<8x1xf32>
    %cst_88 = arith.constant 3.000000e+00 : f32
    %282 = vector.broadcast %cst_88 : f32 to vector<8x1xf32>
    %283 = arith.cmpf ogt, %275, %282 : vector<8x1xf32>
    %cst_89 = arith.constant 3.000000e+00 : f32
    %284 = vector.broadcast %cst_89 : f32 to vector<8x1xf32>
    %285 = arith.subf %284, %275 : vector<8x1xf32>
    %cst_90 = arith.constant 0.000000e+00 : f32
    %286 = vector.broadcast %cst_90 : f32 to vector<8x1xf32>
    %287 = arith.select %283, %286, %285 : vector<8x1xi1>, vector<8x1xf32>
    %c1_i32_91 = arith.constant 1 : i32
    %288 = vector.broadcast %c1_i32_91 : i32 to vector<8x2xi32>
    %289 = arith.cmpi eq, %239, %288 : vector<8x2xi32>
    %290 = vector.shape_cast %281 : vector<8x1xf32> to vector<8x1xf32>
    %291 = vector.broadcast %290 : vector<8x1xf32> to vector<8x2xf32>
    %292 = arith.select %289, %291, %264 : vector<8x2xi1>, vector<8x2xf32>
    %c1_i32_92 = arith.constant 1 : i32
    %293 = vector.broadcast %c1_i32_92 : i32 to vector<8x2xi32>
    %294 = arith.cmpi eq, %239, %293 : vector<8x2xi32>
    %295 = vector.shape_cast %287 : vector<8x1xf32> to vector<8x1xf32>
    %296 = vector.broadcast %295 : vector<8x1xf32> to vector<8x2xf32>
    %297 = arith.select %294, %296, %269 : vector<8x2xi1>, vector<8x2xf32>
    %c0_93 = arith.constant 0 : index
    %c0_94 = arith.constant 0 : index
    %c0_95 = arith.constant 0 : index
    %298 = vector.load %arg3[%c0_93, %c0_94, %c0_95] : memref<2x8x2xf32, #tpu.memory_space<vmem>>, vector<1x8x2xf32>
    %299 = vector.shape_cast %298 : vector<1x8x2xf32> to vector<8x2xf32>
    %300 = vector.shape_cast %292 : vector<8x2xf32> to vector<1x8x2xf32>
    tpu.vector_store %arg3[%c0_93, %c0_94, %c0_95], %300 {strides = array<i32>} : memref<2x8x2xf32, #tpu.memory_space<vmem>>, vector<1x8x2xf32>,
    %c1_96 = arith.constant 1 : index
    %c0_97 = arith.constant 0 : index
    %c0_98 = arith.constant 0 : index
    %301 = vector.load %arg3[%c1_96, %c0_97, %c0_98] : memref<2x8x2xf32, #tpu.memory_space<vmem>>, vector<1x8x2xf32>
    %302 = vector.shape_cast %301 : vector<1x8x2xf32> to vector<8x2xf32>
    %303 = vector.shape_cast %297 : vector<8x2xf32> to vector<1x8x2xf32>
    tpu.vector_store %arg3[%c1_96, %c0_97, %c0_98], %303 {strides = array<i32>} : memref<2x8x2xf32, #tpu.memory_space<vmem>>, vector<1x8x2xf32>,
    return
  }
}

</mosaic_0001>

<bundles_post_ra>
// kernel: tpu_custom_call.1
= control target key start
LH: loop header
LB: loop body
LE: loop exit
PB: predicated region body
PF: predicated region fallthrough
CT: control target
= control target key end

     0   :  { %8 = vsyncpa [#allocation3], 0  ;;  %s328_s12 = smov [#allocation2]   ;;  %s455_s0 = inlined_call_operand.vmem [shape: f32[2,8,16], index: 0, kind: input, shape index: {}]   ;;  %s456_s1 = inlined_call_operand.vmem [shape: f32[18,16], index: 1, kind: input, shape index: {}]   ;;  %s457_s2 = inlined_call_operand.hbm [shape: f32[12,8,16], index: 2, kind: input, shape index: {}]   ;;  %s458_s3 = inlined_call_operand.vmem [shape: f32[2,8,2], index: 3, kind: output, shape index: {}]  }
   0x1   :  { %s18_s13 = sshll.u32 %s328_s12, 4  ;;  %s304_s16 = scalar_lea.hbm %s457_s2, 1536  ;;  %s19_s13 = int_to_ptr.vmem [resolvable:$true] %s18_s13 }
   0x2   :  { %p305_p0 = scmp.ne.s32.totalorder %s457_s2, %s304_s16  ;;  %p308_p1 = scmp.lt.u32.totalorder %s304_s16, %s457_s2 }
   0x4   :  { %p310_p2 = pnand %p308_p1, %p305_p0 }
   0x6   :  { %313 = shalt.err (!%p310_p2)
}
   0x7   :  { %s314_s21 = scalar_lea.vmem %s19_s13, 1536  ;;  %p319_p4 = scmp.lt.s32.totalorder %s19_s13, %s19_s13 }
   0x8   :  { %p315_p3 = scmp.ne.s32.totalorder %s19_s13, %s314_s21  ;;  %p320_p5 = scmp.lt.s32.totalorder %s314_s21, %s314_s21 }
   0xa   :  { %p321_p6 = por %p320_p5, %p319_p4 }
   0xc   :  { %p322_p7 = pnand %p321_p6, %p315_p3 }
   0xe   :  { %325 = shalt.err (!%p322_p7)
}
   0xf   :  { %s329_s22 = smov 128   ;;  %s330_s23 = smov 8  }
  0x10   :  { %24 = dma.hbm_to_vmem [thread:$0]  %s457_s2, 1536, %s19_s13, [#allocation3], %s329_s22, %s329_s22, %s330_s23  }
  0x11   :  { %326 = dma.done.wait [#allocation3], 1536  }
  0x12   :  { %327 = vsyncadd [#allocation3], 4294965760  ;;  %vm30_vm0 = vcmask 126976   ;;  %vm38_vm1 = vcmask 130053   ;;  %vm40_vm2 = vcmask 123904   ;;  %vm54_vm3 = vcmask 128000  }
  0x13   :  { %v28_v0 = vld [vmem:[%s456_s1 + $0x6] sm:$0xff]  ;;  %v29_v1 = vld [vmem:[%s456_s1 + $0xe] sm:$0x3]  ;;  %v53_v2 = vld [vmem:[%s456_s1] sm:$0x3f]  ;;  %v62_v15 = vlaneseq }
  0x14   :  { %v31_v3 = vsel %vm30_vm0, %v28_v0, -inf  ;;  %v39_v4 = vsel %vm38_vm1, %v28_v0, -inf  ;;  %v41_v5 = vsel %vm40_vm2, %v29_v1, -inf  ;;  %v55_v6 = vsel %vm54_vm3, %v53_v2, -inf  ;;  %v76_v36 = vld [vmem:[#allocation2] sm:$0xff]  ;;  %v78_v37 = vld [vmem:[#allocation2 + $0x30] sm:$0xff] }
  0x15   :  { %v32_v7 = vrot.slane %v31_v3, 4  ;;  %v42_v8 = vmax.f32 %v39_v4, %v41_v5  ;;  %v56_v9 = vrot.slane %v55_v6, 4  ;;  %v374_v20 = vshrl.u32 %v62_v15, 7  ;;  %v81_v38 = vld [vmem:[#allocation2 + $0x8] sm:$0xff]  ;;  %v86_v39 = vld [vmem:[#allocation2 + $0x38] sm:$0xff]  ;;  %v90_v41 = vld [vmem:[#allocation2 + $0x10] sm:$0xff] }
  0x16   :  { %v95_v42 = vld [vmem:[#allocation2 + $0x40] sm:$0xff]  ;;  %v99_v44 = vld [vmem:[#allocation2 + $0x18] sm:$0xff]  ;;  %v104_v45 = vld [vmem:[#allocation2 + $0x48] sm:$0xff] }
  0x17   :  { %v43_v10 = vrot.slane %v42_v8, 4  ;;  %v57_v11 = vmax.f32 %v55_v6, %v56_v9  ;;  %v33_v12 = vmax.f32 %v31_v3, %v32_v7  ;;  %v108_v48 = vld [vmem:[#allocation2 + $0x20] sm:$0xff]  ;;  %v113_v49 = vld [vmem:[#allocation2 + $0x50] sm:$0xff]  ;;  %v130_v50 = vsub.s32 0, %v374_v20  ;;  %v117_v53 = vld [vmem:[#allocation2 + $0x28] sm:$0xff] }
  0x18   :  { %v122_v54 = vld [vmem:[#allocation2 + $0x58] sm:$0xff]  ;;  %v135_v55 = vsub.s32 1, %v374_v20  ;;  %v142_v58 = vsub.s32 2, %v374_v20  ;;  %v149_v59 = vsub.s32 3, %v374_v20  ;;  %vm132_vm0 = vcmp.ge.s32.totalorder %v374_v20, 1 }
  0x19   :  { %v44_v13 = vmax.f32 %v42_v8, %v43_v10  ;;  %v58_v14 = vrot.slane %v57_v11, 2  ;;  %v34_v17 = vrot.slane %v33_v12, 2  ;;  %v156_v0 = vsub.s32 4, %v374_v20 }
  0x1a   :  { %vm139_vm1 = vcmp.ge.s32.totalorder %v374_v20, 2  ;;  %v163_v3 = vsub.s32 5, %v374_v20  ;;  %vm146_vm2 = vcmp.ge.s32.totalorder %v374_v20, 3  ;;  %v170_v8 = vsub.s32 6, %v374_v20 }
  0x1b   :  { %v59_v16 = vmax.f32 %v57_v11, %v58_v14  ;;  %v45_v18 = vrot.slane %v44_v13, 2  ;;  %v35_v22 = vmax.f32 %v33_v12, %v34_v17  ;;  %v177_v14 = vsub.s32 7, %v374_v20 }
  0x1d   :  { %v60_v19 = vrot.slane %v59_v16, 1  ;;  %v46_v23 = vmax.f32 %v44_v13, %v45_v18  ;;  %v36_v26 = vrot.slane %v35_v22, 1 }
  0x1f   :  { %v61_v21 = vmax.f32 %v59_v16, %v60_v19  ;;  %v47_v27 = vrot.slane %v46_v23, 1  ;;  %v37_v30 = vmax.f32 %v35_v22, %v36_v26 }
  0x21   :  { %vm64_vm4 = vcmp.eq.f32.partialorder %v53_v2, %v61_v21  ;;  %v48_v31 = vmax.f32 %v46_v23, %v47_v27 }
  0x22   :  { %v65_v24 = vsel %vm64_vm4, %v374_v20, 6  ;;  %vm160_vm4 = vcmp.ge.s32.totalorder %v374_v20, 5 }
  0x23   :  { %v66_v25 = vsel %vm54_vm3, %v65_v24, 2147483647  ;;  %v49_v34 = vmax.f32 %v37_v30, %v48_v31  ;;  %vm51_vm8 = vcmp.gt.f32.partialorder %v48_v31, %v37_v30  ;;  %vm153_vm3 = vcmp.ge.s32.totalorder %v374_v20, 4 }
  0x24   :  { %v67_v28 = vrot.slane %v66_v25, 4 }
  0x25   :  { %vm378_vm9 = vcmp.lt.f32.partialorder %v49_v34, 0.5 }
  0x26   :  { %vm68_vm5 = vcmp.lt.s32.totalorder %v66_v25, %v67_v28  ;;  %vm52_vm15 = vmor %vm378_vm9, %vm51_vm8  ;;  %vm272_vm8 = vcmask 130112   ;;  %vm256_vm9 = vcmask 64512  }
  0x27   :  { %v69_v29 = vsel %vm68_vm5, %v66_v25, %v67_v28  ;;  %vm167_vm5 = vcmp.ge.s32.totalorder %v374_v20, 6 }
  0x28   :  { %v70_v32 = vrot.slane %v69_v29, 2 }
  0x2a   :  { %vm71_vm6 = vcmp.lt.s32.totalorder %v69_v29, %v70_v32 }
  0x2b   :  { %v72_v33 = vsel %vm71_vm6, %v69_v29, %v70_v32  ;;  %vm174_vm6 = vcmp.ge.s32.totalorder %v374_v20, 7 }
  0x2c   :  { %v73_v35 = vrot.slane %v72_v33, 1 }
  0x2e   :  { %vm74_vm7 = vcmp.lt.s32.totalorder %v72_v33, %v73_v35 }
  0x2f   :  { %v75_v40 = vsel %vm74_vm7, %v72_v33, %v73_v35 }
  0x30   :  { %vm79_vm10 = vcmp.eq.s32.totalorder %v75_v40, 1  ;;  %vm88_vm11 = vcmp.eq.s32.totalorder %v75_v40, 2  ;;  %vm97_vm12 = vcmp.eq.s32.totalorder %v75_v40, 3  ;;  %vm106_vm13 = vcmp.eq.s32.totalorder %v75_v40, 4 }
  0x31   :  { %v84_v46 = vsel %vm79_vm10, %v81_v38, %v76_v36  ;;  %v87_v47 = vsel %vm79_vm10, %v86_v39, %v78_v37  ;;  %vm115_vm14 = vcmp.eq.s32.totalorder %v75_v40, 5 }
  0x32   :  { %v93_v51 = vsel %vm88_vm11, %v90_v41, %v84_v46  ;;  %v96_v52 = vsel %vm88_vm11, %v95_v42, %v87_v47  ;;  %v297_v47 = vld [vmem:[%s456_s1 + $0x10] ss:$0 sm:$0xff] }
  0x33   :  { %v102_v56 = vsel %vm97_vm12, %v99_v44, %v93_v51  ;;  %v105_v57 = vsel %vm97_vm12, %v104_v45, %v96_v52  ;;  %v239_v51 = vld [vmem:[%s455_s0] sm:$0xff] }
  0x34   :  { %v111_v60 = vsel %vm106_vm13, %v108_v48, %v102_v56  ;;  %v114_v61 = vsel %vm106_vm13, %v113_v49, %v105_v57  ;;  %v299_v57 = vld [vmem:[%s455_s0 + $0x8] sm:$0xff] }
  0x35   :  { %v120_v62 = vsel %vm115_vm14, %v117_v53, %v111_v60  ;;  %v123_v63 = vsel %vm115_vm14, %v122_v54, %v114_v61  ;;  %v298_v54 = vld [vmem:[%s456_s1 + $0x11] ss:$0 sm:$0xff]  ;;  %vm288_vm14 = vcmask 15360  }
  0x36   :  { %v126_v1 = vsel %vm52_vm15, 1000000.0, %v120_v62  ;;  %v127_v2 = vsel %vm52_vm15, 1000000.0, %v123_v63 }
  0x37   :  { %v131_v4 = vrot.slane %v126_v1, %v130_v50  ;;  %v136_v5 = vrot.slane %v126_v1, %v135_v55  ;;  %v143_v6 = vrot.slane %v126_v1, %v142_v58  ;;  %v150_v7 = vrot.slane %v126_v1, %v149_v59 }
  0x38   :  { %v157_v11 = vrot.slane %v126_v1, %v156_v0  ;;  %v164_v13 = vrot.slane %v126_v1, %v163_v3  ;;  %v184_v16 = vrot.slane %v127_v2, %v130_v50  ;;  %v188_v18 = vrot.slane %v127_v2, %v135_v55 }
  0x39   :  { %v137_v9 = vsel %vm132_vm0, %v136_v5, 0.0  ;;  %v144_v10 = vsel %vm139_vm1, %v143_v6, 0.0  ;;  %v151_v17 = vsel %vm146_vm2, %v150_v7, 0.0  ;;  %v194_v19 = vrot.slane %v127_v2, %v142_v58 }
  0x3a   :  { %v138_v12 = vadd.f32 %v137_v9, %v131_v4  ;;  %v200_v21 = vrot.slane %v127_v2, %v149_v59  ;;  %v171_v23 = vrot.slane %v126_v1, %v170_v8  ;;  %v158_v24 = vsel %vm153_vm3, %v157_v11, 0.0 }
  0x3b   :  { %v189_v25 = vsel %vm132_vm0, %v188_v18, 0.0  ;;  %v195_v26 = vsel %vm139_vm1, %v194_v19, 0.0  ;;  %v206_v27 = vrot.slane %v127_v2, %v156_v0  ;;  %v165_v30 = vsel %vm160_vm4, %v164_v13, 0.0 }
  0x3c   :  { %v145_v22 = vadd.f32 %v144_v10, %v138_v12  ;;  %v190_v29 = vadd.f32 %v189_v25, %v184_v16  ;;  %v178_v31 = vrot.slane %v126_v1, %v177_v14  ;;  %v201_v32 = vsel %vm146_vm2, %v200_v21, 0.0 }
  0x3d   :  { %v212_v33 = vrot.slane %v127_v2, %v163_v3  ;;  %v172_v36 = vsel %vm167_vm5, %v171_v23, 0.0  ;;  %v207_v37 = vsel %vm153_vm3, %v206_v27, 0.0  ;;  %v218_v38 = vrot.slane %v127_v2, %v170_v8 }
  0x3e   :  { %v152_v28 = vadd.f32 %v151_v17, %v145_v22  ;;  %v196_v35 = vadd.f32 %v195_v26, %v190_v29  ;;  %v179_v41 = vsel %vm174_vm6, %v178_v31, 0.0  ;;  %v224_v43 = vrot.slane %v127_v2, %v177_v14 }
  0x3f   :  { %v213_v42 = vsel %vm160_vm4, %v212_v33, 0.0  ;;  %v219_v46 = vsel %vm167_vm5, %v218_v38, 0.0  ;;  %v255_v8 = vand.u32 127, %v62_v15 }
  0x40   :  { %v159_v34 = vadd.f32 %v158_v24, %v152_v28  ;;  %v202_v40 = vadd.f32 %v201_v32, %v196_v35  ;;  %v225_v50 = vsel %vm174_vm6, %v224_v43, 0.0 }
  0x41   :  { %vm269_vm10 = vcmp.eq.s32.totalorder %v255_v8, 0  ;;  %vm285_vm13 = vcmp.eq.s32.totalorder %v255_v8, 1 }
  0x42   :  { %v166_v39 = vadd.f32 %v165_v30, %v159_v34  ;;  %v208_v45 = vadd.f32 %v207_v37, %v202_v40 }
  0x44   :  { %v173_v44 = vadd.f32 %v172_v36, %v166_v39  ;;  %v214_v49 = vadd.f32 %v213_v42, %v208_v45 }
  0x46   :  { %v180_v48 = vadd.f32 %v179_v41, %v173_v44  ;;  %v220_v52 = vadd.f32 %v219_v46, %v214_v49 }
  0x48   :  { %v233_v53 = vadd.f32 %v297_v47, %v180_v48  ;;  %v226_v55 = vadd.f32 %v225_v50, %v220_v52 }
  0x4a   :  { %v242_v56 = vsub.f32 %v239_v51, %v233_v53  ;;  %v238_v58 = vadd.f32 %v298_v54, %v226_v55 }
  0x4c   :  { %v243_v59 = vsub.f32 %v299_v57, %v238_v58  ;;  %v244_v20 = vmul.f32 %v242_v56, %v242_v56 }
  0x4e   :  { %v245_v60 = vmul.f32 %v243_v59, %v243_v59 }
  0x50   :  { %v246_v61 = vadd.f32 %v245_v60, %v244_v20 }
  0x52   :  { %vm247_vm7 = vcmp.gt.f32.partialorder %v246_v61, 9.0 }
  0x53   :  { %v248_v62 = vsel %vm247_vm7, 1000000.0, %v233_v53  ;;  %v249_v63 = vsel %vm247_vm7, 1000000.0, %v238_v58 }
  0x54   :  { %v250_v0 = vsub.f32 %v239_v51, %v248_v62  ;;  %v252_v1 = vsub.f32 %v299_v57, %v249_v63 }
  0x56   :  { %v251_v2 = vand.u32 2147483647, %v250_v0  ;;  %v253_v3 = vand.u32 2147483647, %v252_v1 }
  0x58   :  { %v273_v4 = vsel %vm272_vm8, %v251_v2, inf  ;;  %v257_v5 = vsel %vm256_vm9, %v251_v2, inf  ;;  %v276_v6 = vsel %vm272_vm8, %v253_v3, inf  ;;  %v260_v7 = vsel %vm256_vm9, %v253_v3, inf }
  0x59   :  { %274 = vmin.xlane.f32.xlu1 %v273_v4  ;;  %258 = vmin.xlane.f32.xlu0 %v257_v5 }
  0x5d   :  { %277 = vmin.xlane.f32.xlu1 %v276_v6  ;;  %261 = vmin.xlane.f32.xlu0 %v260_v7 }
  0xe6   :  { %v275_v9 = vpop.xlane.xlu1 %274  ;;  %v259_v10 = vpop.xlane.xlu0 %258 }
  0xe7   :  { %vm279_vm11 = vcmp.gt.f32.partialorder %v275_v9, 1.5  ;;  %v280_v11 = vsub.f32 1.5, %v275_v9  ;;  %vm263_vm12 = vcmp.gt.f32.partialorder %v259_v10, 1.5  ;;  %v264_v12 = vsub.f32 1.5, %v259_v10 }
  0xe9   :  { %v281_v13 = vsel %vm279_vm11, 0.0, %v280_v11  ;;  %v265_v14 = vsel %vm263_vm12, 0.0, %v264_v12 }
  0xea   :  { %v278_v16 = vpop.xlane.xlu1 %277  ;;  %v270_v17 = vsel %vm269_vm10, %v265_v14, 0.0  ;;  %v262_v18 = vpop.xlane.xlu0 %261 }
  0xeb   :  { %vm282_vm15 = vcmp.gt.f32.partialorder %v278_v16, 3.0  ;;  %v283_v19 = vsub.f32 3.0, %v278_v16  ;;  %v286_v21 = vsel %vm285_vm13, %v281_v13, %v270_v17  ;;  %vm266_vm0 = vcmp.gt.f32.partialorder %v262_v18, 3.0 }
  0xec   :  { %289 = vst.msk [vmem:[%s458_s3] sm:$0xff] %vm288_vm14, %v286_v21  ;;  %v267_v15 = vsub.f32 3.0, %v262_v18 }
  0xed   :  { %v284_v22 = vsel %vm282_vm15, 0.0, %v283_v19 }
  0xee   :  { %v268_v23 = vsel %vm266_vm0, 0.0, %v267_v15 }
  0xef   :  { %v271_v24 = vsel %vm269_vm10, %v268_v23, 0.0 }
  0xf0   :  { %v287_v25 = vsel %vm285_vm13, %v284_v22, %v271_v24 }
  0xf1   :  { %300 = vst.msk [vmem:[%s458_s3 + $0x8] sm:$0xff] %vm288_vm14, %v287_v25 }
  0xf2   :  { %296 = vsyncpa [#allocation3], 1 }

</bundles_post_ra>
